<compile_context>
chip_gen: v5e
topology: v5e:2x2
jax: 0.10.0
libtpu: 0.0.40
codegen_flags: <defaults>
</compile_context>

<pallas_src>
import functools

import jax
import jax.numpy as jnp
from jax.experimental import pallas as pl
from jax.experimental.pallas import tpu as pltpu

INPUT_SIZE = 111
HIDDEN_SIZE = 500
NUM_TASKS = 11          # task_output_sizes = [1] * 11

IN_PAD = 128            # input features padded to one full lane width
HID_PAD = 512           # hidden padded to a multiple of 128 lanes / 8 sublanes
OUT_PAD = 128           # fused task-head output padded to one full lane width


def _round_up(n, m):
    return ((n + m - 1) // m) * m


def _multitask_kernel(x_ref, w1_ref, b1_ref, w2_ref, b2_ref, out_ref):
    """Fused forward for one batch tile: relu(x @ W1 + b1) @ W2 + b2."""
    # Shared layer: (TB, 128) @ (128, 512) -> (TB, 512), f32 accumulation on the MXU.
    shared = jnp.dot(x_ref[...], w1_ref[...], preferred_element_type=jnp.float32)
    shared = jnp.maximum(shared + b1_ref[...], 0.0)        # bias broadcast + ReLU on VPU

    # All 11 task heads fused (lane-padded to 128): (TB, 512) @ (512, 128) -> (TB, 128)
    tasks = jnp.dot(shared, w2_ref[...], preferred_element_type=jnp.float32)
    out_ref[...] = (tasks + b2_ref[...]).astype(out_ref.dtype)


@functools.partial(jax.jit, static_argnames=("block_batch",))
def multitask_forward(x, w1, b1, w2, b2, *, block_batch=1024):
    """x: (B, INPUT_SIZE) f32 -> (B, NUM_TASKS) f32 (fused task outputs)."""
    batch = x.shape[0]

    # Batch tile: multiple of 8, capped at block_batch; pad batch to a multiple of it.
    tb = min(block_batch, _round_up(batch, 8))
    padded_b = _round_up(batch, tb)

    # Zero-padding (inside jit, outside the kernel) for dense, tile-aligned DMAs.
    x_p = jnp.pad(x, ((0, padded_b - batch), (0, IN_PAD - INPUT_SIZE)))
    w1_p = jnp.pad(w1, ((0, IN_PAD - INPUT_SIZE), (0, HID_PAD - HIDDEN_SIZE)))
    b1_p = jnp.pad(b1, ((0, 0), (0, HID_PAD - HIDDEN_SIZE)))           # relu(0+0)=0
    w2_p = jnp.pad(w2, ((0, HID_PAD - HIDDEN_SIZE), (0, OUT_PAD - NUM_TASKS)))
    b2_p = jnp.pad(b2, ((0, 0), (0, OUT_PAD - NUM_TASKS)))

    grid = (padded_b // tb,)

    out = pl.pallas_call(
        _multitask_kernel,
        out_shape=jax.ShapeDtypeStruct((padded_b, OUT_PAD), jnp.float32),
        grid_spec=pltpu.PrefetchScalarGridSpec(
            num_scalar_prefetch=0,
            grid=grid,
            in_specs=[
                pl.BlockSpec((tb, IN_PAD), lambda i: (i, 0)),           # x: tiled on batch
                pl.BlockSpec((IN_PAD, HID_PAD), lambda i: (0, 0)),      # W1: resident
                pl.BlockSpec((1, HID_PAD), lambda i: (0, 0)),           # b1: resident
                pl.BlockSpec((HID_PAD, OUT_PAD), lambda i: (0, 0)),     # W2 (fused): resident
                pl.BlockSpec((1, OUT_PAD), lambda i: (0, 0)),           # b2 (fused): resident
            ],
            out_specs=pl.BlockSpec((tb, OUT_PAD), lambda i: (i, 0)),    # lane-dense output
        ),
        compiler_params=pltpu.CompilerParams(
            dimension_semantics=("parallel",),   # megacore-shardable batch axis
        ),
    )(x_p, w1_p, b1_p, w2_p, b2_p)

    return out[:batch, :NUM_TASKS]


def multitask_nn_forward(x, params, *, block_batch=1024):
    """Mirrors MultiTaskNN.forward: returns a list of 11 arrays of shape (B, 1)."""
    w1, b1, w2, b2 = params
    fused = multitask_forward(x, w1, b1, w2, b2, block_batch=block_batch)  # (B, 11)
    return jnp.split(fused, NUM_TASKS, axis=1)


def init_params(key):
    """Deterministic init mimicking PyTorch nn.Linear default (uniform +-1/sqrt(fan_in)).
    Weights stored transposed relative to torch: (in_features, out_features)."""
    k1, k2, k3, k4 = jax.random.split(key, 4)
    bound1 = 1.0 / jnp.sqrt(jnp.float32(INPUT_SIZE))
    bound2 = 1.0 / jnp.sqrt(jnp.float32(HIDDEN_SIZE))
    w1 = jax.random.uniform(k1, (INPUT_SIZE, HIDDEN_SIZE), jnp.float32, -bound1, bound1)
    b1 = jax.random.uniform(k2, (1, HIDDEN_SIZE), jnp.float32, -bound1, bound1)
    # 11 heads of shape (HIDDEN_SIZE, 1) fused into (HIDDEN_SIZE, NUM_TASKS).
    w2 = jax.random.uniform(k3, (HIDDEN_SIZE, NUM_TASKS), jnp.float32, -bound2, bound2)
    b2 = jax.random.uniform(k4, (1, NUM_TASKS), jnp.float32, -bound2, bound2)
    return w1, b1, w2, b2


def reference_forward(x, params):
    """Pure-JAX reference of the PyTorch forward pass."""
    w1, b1, w2, b2 = params
    shared = jnp.maximum(x @ w1 + b1, 0.0)
    fused = shared @ w2 + b2
    return jnp.split(fused, NUM_TASKS, axis=1)


if __name__ == "__main__":
    key = jax.random.PRNGKey(0)
    pkey, xkey1, xkey2 = jax.random.split(key, 3)
    params = init_params(pkey)

    # Case 1: tiny batch (single grid step).
    batch1 = 8
    x1 = jax.random.normal(xkey1, (batch1, INPUT_SIZE), jnp.float32)
    outs1 = multitask_nn_forward(x1, params)
    outs1 = [jax.block_until_ready(o) for o in outs1]
    refs1 = reference_forward(x1, params)
    for got, ref in zip(outs1, refs1):
        assert got.shape == (batch1, 1), got.shape
        assert jnp.allclose(got, ref, atol=1e-4, rtol=1e-4), "mismatch vs reference (case 1)"

    # Case 2: batch not divisible by the tile -> exercises padding + multi-step grid.
    batch2 = 40
    x2 = jax.random.normal(xkey2, (batch2, INPUT_SIZE), jnp.float32)
    outs2 = multitask_nn_forward(x2, params, block_batch=16)   # grid = (3,), padded to 48
    outs2 = [jax.block_until_ready(o) for o in outs2]
    refs2 = reference_forward(x2, params)
    for got, ref in zip(outs2, refs2):
        assert got.shape == (batch2, 1), got.shape
        assert jnp.allclose(got, ref, atol=1e-4, rtol=1e-4), "mismatch vs reference (case 2)"

    print("KERNEL_OK")
</pallas_src>

<mosaic_0001>
module attributes {stable_mosaic.version = 11 : i64} {
  func.func @_multitask_kernel(%arg0: i32, %arg1: memref<8x128xf32, #tpu.memory_space<vmem>>, %arg2: memref<128x512xf32, #tpu.memory_space<vmem>>, %arg3: memref<1x512xf32, #tpu.memory_space<vmem>>, %arg4: memref<512x128xf32, #tpu.memory_space<vmem>>, %arg5: memref<1x128xf32, #tpu.memory_space<vmem>>, %arg6: memref<8x128xf32, #tpu.memory_space<vmem>>) attributes {dimension_semantics = [#tpu.dimension_semantics<parallel>], iteration_bounds = array<i64: 1>, scalar_prefetch = 0 : i64, scratch_operands = 0 : i64, tpu.core_type = #tpu.core_type<tc>, window_params = [{transform_indices = @transform_0, window_bounds = array<i64: 8, 128>}, {pipeline_mode = #tpu.pipeline_mode<synchronous>, transform_indices = @transform_1, window_bounds = array<i64: 128, 512>}, {pipeline_mode = #tpu.pipeline_mode<synchronous>, transform_indices = @transform_2, window_bounds = array<i64: 1, 512>}, {pipeline_mode = #tpu.pipeline_mode<synchronous>, transform_indices = @transform_3, window_bounds = array<i64: 512, 128>}, {pipeline_mode = #tpu.pipeline_mode<synchronous>, transform_indices = @transform_4, window_bounds = array<i64: 1, 128>}, {transform_indices = @transform_5, window_bounds = array<i64: 8, 128>}]} {
    %c0 = arith.constant 0 : index
    %c0_0 = arith.constant 0 : index
    %0 = vector.load %arg1[%c0, %c0_0] : memref<8x128xf32, #tpu.memory_space<vmem>>, vector<8x128xf32>
    %c0_1 = arith.constant 0 : index
    %c0_2 = arith.constant 0 : index
    %1 = vector.load %arg2[%c0_1, %c0_2] : memref<128x512xf32, #tpu.memory_space<vmem>>, vector<128x512xf32>
    %cst = arith.constant dense<0.000000e+00> : vector<8x512xf32>
    %2 = tpu.matmul %0, %1, %cst {dimension_numbers = #tpu.dot_dimension_numbers<[1], [0], [0], [1], [0, 0, 1, 1], [], []>} : vector<8x128xf32>, vector<128x512xf32>, vector<8x512xf32> -> vector<8x512xf32>
    %c0_3 = arith.constant 0 : index
    %c0_4 = arith.constant 0 : index
    %3 = vector.load %arg3[%c0_3, %c0_4] : memref<1x512xf32, #tpu.memory_space<vmem>>, vector<1x512xf32>
    %4 = vector.broadcast %3 : vector<1x512xf32> to vector<8x512xf32>
    %5 = arith.addf %2, %4 : vector<8x512xf32>
    %cst_5 = arith.constant 0.000000e+00 : f32
    %6 = vector.broadcast %cst_5 : f32 to vector<8x512xf32>
    %7 = arith.maximumf %5, %6 : vector<8x512xf32>
    %c0_6 = arith.constant 0 : index
    %c0_7 = arith.constant 0 : index
    %8 = vector.load %arg4[%c0_6, %c0_7] : memref<512x128xf32, #tpu.memory_space<vmem>>, vector<512x128xf32>
    %cst_8 = arith.constant dense<0.000000e+00> : vector<8x128xf32>
    %9 = tpu.matmul %7, %8, %cst_8 {dimension_numbers = #tpu.dot_dimension_numbers<[1], [0], [0], [1], [0, 0, 1, 1], [], []>} : vector<8x512xf32>, vector<512x128xf32>, vector<8x128xf32> -> vector<8x128xf32>
    %c0_9 = arith.constant 0 : index
    %c0_10 = arith.constant 0 : index
    %10 = vector.load %arg5[%c0_9, %c0_10] : memref<1x128xf32, #tpu.memory_space<vmem>>, vector<1x128xf32>
    %11 = vector.broadcast %10 : vector<1x128xf32> to vector<8x128xf32>
    %12 = arith.addf %9, %11 : vector<8x128xf32>
    %c0_11 = arith.constant 0 : index
    %c0_12 = arith.constant 0 : index
    %13 = vector.load %arg6[%c0_11, %c0_12] : memref<8x128xf32, #tpu.memory_space<vmem>>, vector<8x128xf32>
    tpu.vector_store %arg6[%c0_11, %c0_12], %12 {strides = array<i32>} : memref<8x128xf32, #tpu.memory_space<vmem>>, vector<8x128xf32>,
    return
  }
  func.func @transform_0(%arg0: i32) -> (i32, i32) {
    %c0_i32 = arith.constant 0 : i32
    %c0_i32_0 = arith.constant 0 : i32
    return %arg0, %c0_i32 : i32, i32
  }
  func.func @transform_1(%arg0: i32) -> (i32, i32) {
    %c0_i32 = arith.constant 0 : i32
    %c0_i32_0 = arith.constant 0 : i32
    %c0_i32_1 = arith.constant 0 : i32
    return %c0_i32, %c0_i32_0 : i32, i32
  }
  func.func @transform_2(%arg0: i32) -> (i32, i32) {
    %c0_i32 = arith.constant 0 : i32
    %c0_i32_0 = arith.constant 0 : i32
    %c0_i32_1 = arith.constant 0 : i32
    return %c0_i32, %c0_i32_0 : i32, i32
  }
  func.func @transform_3(%arg0: i32) -> (i32, i32) {
    %c0_i32 = arith.constant 0 : i32
    %c0_i32_0 = arith.constant 0 : i32
    %c0_i32_1 = arith.constant 0 : i32
    return %c0_i32, %c0_i32_0 : i32, i32
  }
  func.func @transform_4(%arg0: i32) -> (i32, i32) {
    %c0_i32 = arith.constant 0 : i32
    %c0_i32_0 = arith.constant 0 : i32
    %c0_i32_1 = arith.constant 0 : i32
    return %c0_i32, %c0_i32_0 : i32, i32
  }
  func.func @transform_5(%arg0: i32) -> (i32, i32) {
    %c0_i32 = arith.constant 0 : i32
    %c0_i32_0 = arith.constant 0 : i32
    return %arg0, %c0_i32 : i32, i32
  }
}

</mosaic_0001>

<bundles_post_ra>
// kernel: multitask_forward.1
= control target key start
LH: loop header
LB: loop body
LE: loop exit
PB: predicated region body
PF: predicated region fallthrough
CT: control target
= control target key end

     0   :  { %s800_s0 = inlined_call_operand.vmem [shape: f32[8,128], index: 0, kind: input, shape index: {}]   ;;  %s801_s1 = inlined_call_operand.vmem [shape: f32[128,512], index: 1, kind: input, shape index: {}]   ;;  %s802_s2 = inlined_call_operand.vmem [shape: f32[1,512], index: 2, kind: input, shape index: {}]   ;;  %s803_s3 = inlined_call_operand.vmem [shape: f32[512,128], index: 3, kind: input, shape index: {}]   ;;  %s804_s4 = inlined_call_operand.vmem [shape: f32[1,128], index: 4, kind: input, shape index: {}]   ;;  %s805_s5 = inlined_call_operand.hbm [shape: f32[8,128], index: 5, kind: output, shape index: {}]  }
   0x1   :  { %v84_v0 = vld [vmem:[%s801_s1 + $0x1f0] sm:$0xff]  ;;  %v85_v2 = vld [vmem:[%s801_s1 + $0x1f8] sm:$0xff]  ;;  %v82_v6 = vld [vmem:[%s801_s1 + $0x1e0] sm:$0xff] }
   0x2   :  { %v80_v1 = vld [vmem:[%s801_s1 + $0x1d0] sm:$0xff]  ;;  %136 = vmatpush.msra.mxu2 %v84_v0  ;;  %156 = vmatpush.msra.mxu3 %v85_v2  ;;  %v81_v3 = vld [vmem:[%s801_s1 + $0x1d8] sm:$0xff]  ;;  %v78_v7 = vld [vmem:[%s801_s1 + $0x1c0] sm:$0xff] }
   0x3   :  { %v76_v4 = vld [vmem:[%s801_s1 + $0x1b0] sm:$0xff]  ;;  %v77_v5 = vld [vmem:[%s801_s1 + $0x1b8] sm:$0xff]  ;;  %v83_v8 = vld [vmem:[%s801_s1 + $0x1e8] sm:$0xff]  ;;  %96 = vmatpush.msra.mxu0 %v82_v6 }
   0x4   :  { %137 = vmatpush.msra.mxu2 %v80_v1  ;;  %157 = vmatpush.msra.mxu3 %v81_v3  ;;  %v72_v9 = vld [vmem:[%s801_s1 + $0x190] sm:$0xff]  ;;  %v73_v10 = vld [vmem:[%s801_s1 + $0x198] sm:$0xff]  ;;  %v74_v11 = vld [vmem:[%s801_s1 + $0x1a0] sm:$0xff] }
   0x5   :  { %116 = vmatpush.msra.mxu1 %v83_v8  ;;  %v79_v12 = vld [vmem:[%s801_s1 + $0x1c8] sm:$0xff]  ;;  %v68_v13 = vld [vmem:[%s801_s1 + $0x170] sm:$0xff]  ;;  %97 = vmatpush.msra.mxu0 %v78_v7  ;;  %v69_v14 = vld [vmem:[%s801_s1 + $0x178] sm:$0xff] }
   0x6   :  { %138 = vmatpush.msra.mxu2 %v76_v4  ;;  %158 = vmatpush.msra.mxu3 %v77_v5  ;;  %v75_v15 = vld [vmem:[%s801_s1 + $0x1a8] sm:$0xff]  ;;  %v70_v16 = vld [vmem:[%s801_s1 + $0x180] sm:$0xff]  ;;  %v64_v18 = vld [vmem:[%s801_s1 + $0x150] sm:$0xff] }
   0x7   :  { %117 = vmatpush.msra.mxu1 %v79_v12  ;;  %v71_v17 = vld [vmem:[%s801_s1 + $0x188] sm:$0xff]  ;;  %98 = vmatpush.msra.mxu0 %v74_v11  ;;  %v65_v19 = vld [vmem:[%s801_s1 + $0x158] sm:$0xff]  ;;  %v66_v20 = vld [vmem:[%s801_s1 + $0x160] sm:$0xff] }
   0x8   :  { %139 = vmatpush.msra.mxu2 %v72_v9  ;;  %159 = vmatpush.msra.mxu3 %v73_v10  ;;  %v67_v21 = vld [vmem:[%s801_s1 + $0x168] sm:$0xff]  ;;  %v60_v22 = vld [vmem:[%s801_s1 + $0x130] sm:$0xff]  ;;  %v61_v23 = vld [vmem:[%s801_s1 + $0x138] sm:$0xff] }
   0x9   :  { %118 = vmatpush.msra.mxu1 %v75_v15  ;;  %99 = vmatpush.msra.mxu0 %v70_v16  ;;  %v62_v24 = vld [vmem:[%s801_s1 + $0x140] sm:$0xff]  ;;  %v63_v25 = vld [vmem:[%s801_s1 + $0x148] sm:$0xff]  ;;  %v56_v26 = vld [vmem:[%s801_s1 + $0x110] sm:$0xff] }
   0xa   :  { %140 = vmatpush.msra.mxu2 %v68_v13  ;;  %160 = vmatpush.msra.mxu3 %v69_v14  ;;  %v57_v27 = vld [vmem:[%s801_s1 + $0x118] sm:$0xff]  ;;  %v58_v28 = vld [vmem:[%s801_s1 + $0x120] sm:$0xff]  ;;  %v59_v29 = vld [vmem:[%s801_s1 + $0x128] sm:$0xff] }
   0xb   :  { %119 = vmatpush.msra.mxu1 %v71_v17  ;;  %100 = vmatpush.msra.mxu0 %v66_v20  ;;  %v52_v30 = vld [vmem:[%s801_s1 + $0xf0] sm:$0xff]  ;;  %v53_v31 = vld [vmem:[%s801_s1 + $0xf8] sm:$0xff]  ;;  %v54_v32 = vld [vmem:[%s801_s1 + $0x100] sm:$0xff] }
   0xc   :  { %141 = vmatpush.msra.mxu2 %v64_v18  ;;  %161 = vmatpush.msra.mxu3 %v65_v19  ;;  %v55_v33 = vld [vmem:[%s801_s1 + $0x108] sm:$0xff]  ;;  %v48_v34 = vld [vmem:[%s801_s1 + $0xd0] sm:$0xff]  ;;  %v49_v35 = vld [vmem:[%s801_s1 + $0xd8] sm:$0xff] }
   0xd   :  { %120 = vmatpush.msra.mxu1 %v67_v21  ;;  %101 = vmatpush.msra.mxu0 %v62_v24  ;;  %v50_v36 = vld [vmem:[%s801_s1 + $0xe0] sm:$0xff]  ;;  %v51_v37 = vld [vmem:[%s801_s1 + $0xe8] sm:$0xff]  ;;  %v44_v38 = vld [vmem:[%s801_s1 + $0xb0] sm:$0xff] }
   0xe   :  { %142 = vmatpush.msra.mxu2 %v60_v22  ;;  %162 = vmatpush.msra.mxu3 %v61_v23  ;;  %v45_v39 = vld [vmem:[%s801_s1 + $0xb8] sm:$0xff]  ;;  %v46_v40 = vld [vmem:[%s801_s1 + $0xc0] sm:$0xff]  ;;  %v47_v41 = vld [vmem:[%s801_s1 + $0xc8] sm:$0xff] }
   0xf   :  { %121 = vmatpush.msra.mxu1 %v63_v25  ;;  %102 = vmatpush.msra.mxu0 %v58_v28  ;;  %v40_v42 = vld [vmem:[%s801_s1 + $0x90] sm:$0xff]  ;;  %v41_v43 = vld [vmem:[%s801_s1 + $0x98] sm:$0xff]  ;;  %v42_v44 = vld [vmem:[%s801_s1 + $0xa0] sm:$0xff] }
  0x10   :  { %143 = vmatpush.msra.mxu2 %v56_v26  ;;  %163 = vmatpush.msra.mxu3 %v57_v27  ;;  %v43_v45 = vld [vmem:[%s801_s1 + $0xa8] sm:$0xff]  ;;  %v36_v46 = vld [vmem:[%s801_s1 + $0x70] sm:$0xff]  ;;  %v37_v47 = vld [vmem:[%s801_s1 + $0x78] sm:$0xff] }
  0x11   :  { %122 = vmatpush.msra.mxu1 %v59_v29  ;;  %103 = vmatpush.msra.mxu0 %v54_v32  ;;  %v38_v48 = vld [vmem:[%s801_s1 + $0x80] sm:$0xff]  ;;  %v39_v49 = vld [vmem:[%s801_s1 + $0x88] sm:$0xff]  ;;  %v32_v50 = vld [vmem:[%s801_s1 + $0x50] sm:$0xff] }
  0x12   :  { %144 = vmatpush.msra.mxu2 %v52_v30  ;;  %164 = vmatpush.msra.mxu3 %v53_v31  ;;  %v33_v51 = vld [vmem:[%s801_s1 + $0x58] sm:$0xff]  ;;  %v34_v52 = vld [vmem:[%s801_s1 + $0x60] sm:$0xff]  ;;  %v35_v53 = vld [vmem:[%s801_s1 + $0x68] sm:$0xff] }
  0x13   :  { %123 = vmatpush.msra.mxu1 %v55_v33  ;;  %104 = vmatpush.msra.mxu0 %v50_v36  ;;  %v28_v54 = vld [vmem:[%s801_s1 + $0x30] sm:$0xff]  ;;  %v29_v55 = vld [vmem:[%s801_s1 + $0x38] sm:$0xff]  ;;  %v30_v56 = vld [vmem:[%s801_s1 + $0x40] sm:$0xff] }
  0x14   :  { %145 = vmatpush.msra.mxu2 %v48_v34  ;;  %165 = vmatpush.msra.mxu3 %v49_v35  ;;  %v31_v57 = vld [vmem:[%s801_s1 + $0x48] sm:$0xff]  ;;  %v24_v58 = vld [vmem:[%s801_s1 + $0x10] sm:$0xff]  ;;  %v25_v59 = vld [vmem:[%s801_s1 + $0x18] sm:$0xff] }
  0x15   :  { %124 = vmatpush.msra.mxu1 %v51_v37  ;;  %105 = vmatpush.msra.mxu0 %v46_v40  ;;  %v21_v60 = vld [vmem:[%s800_s0] sm:$0xff]  ;;  %v27_v62 = vld [vmem:[%s801_s1 + $0x28] sm:$0xff]  ;;  %v227_v63 = vld [vmem:[%s803_s3 + $0x178] sm:$0xff] }
  0x16   :  { %146 = vmatpush.msra.mxu2 %v44_v38  ;;  %166 = vmatpush.msra.mxu3 %v45_v39  ;;  %v26_v61 = vld [vmem:[%s801_s1 + $0x20] sm:$0xff]  ;;  %v243_v0 = vld [vmem:[%s803_s3 + $0x1f8] sm:$0xff]  ;;  %v23_v2 = vld [vmem:[%s801_s1 + $0x8] sm:$0xff] }
  0x17   :  { %125 = vmatpush.msra.mxu1 %v47_v41  ;;  %106 = vmatpush.msra.mxu0 %v42_v44  ;;  %v22_v1 = vld [vmem:[%s801_s1] sm:$0xff]  ;;  %v195_v3 = vld [vmem:[%s803_s3 + $0x78] sm:$0xff]  ;;  %v226_v4 = vld [vmem:[%s803_s3 + $0x170] sm:$0xff] }
  0x18   :  { %147 = vmatpush.msra.mxu2 %v40_v42  ;;  %167 = vmatpush.msra.mxu3 %v41_v43  ;;  %v211_v5 = vld [vmem:[%s803_s3 + $0xf8] sm:$0xff]  ;;  %v242_v6 = vld [vmem:[%s803_s3 + $0x1f0] sm:$0xff]  ;;  %v225_v8 = vld [vmem:[%s803_s3 + $0x168] sm:$0xff] }
  0x19   :  { %126 = vmatpush.msra.mxu1 %v43_v45  ;;  %107 = vmatpush.msra.mxu0 %v38_v48  ;;  %v194_v7 = vld [vmem:[%s803_s3 + $0x70] sm:$0xff]  ;;  %v193_v9 = vld [vmem:[%s803_s3 + $0x68] sm:$0xff]  ;;  %v224_v12 = vld [vmem:[%s803_s3 + $0x160] sm:$0xff] }
  0x1a   :  { %148 = vmatpush.msra.mxu2 %v36_v46  ;;  %168 = vmatpush.msra.mxu3 %v37_v47  ;;  %v210_v10 = vld [vmem:[%s803_s3 + $0xf0] sm:$0xff]  ;;  %v241_v11 = vld [vmem:[%s803_s3 + $0x1e8] sm:$0xff] }
  0x1b   :  { %127 = vmatpush.msra.mxu1 %v39_v49  ;;  %108 = vmatpush.msra.mxu0 %v34_v52 }
  0x1c   :  { %149 = vmatpush.msra.mxu2 %v32_v50  ;;  %169 = vmatpush.msra.mxu3 %v33_v51 }
  0x1d   :  { %128 = vmatpush.msra.mxu1 %v35_v53  ;;  %109 = vmatpush.msra.mxu0 %v30_v56 }
  0x1e   :  { %150 = vmatpush.msra.mxu2 %v28_v54  ;;  %170 = vmatpush.msra.mxu3 %v29_v55 }
  0x1f   :  { %129 = vmatpush.msra.mxu1 %v31_v57  ;;  %110 = vmatpush.msra.mxu0 %v26_v61 }
  0x20   :  { %151 = vmatpush.msra.mxu2 %v24_v58  ;;  %171 = vmatpush.msra.mxu3 %v25_v59 }
  0x21   :  { %152 = vmatmul.f32.vlgmr.msra.gmra.mxu2 %v21_v60  ;;  %172 = vmatmul.f32.vlgmr.msra.gmra.mxu3 %v21_v60 }
  0x22   :  { %130 = vmatpush.msra.mxu1 %v27_v62  ;;  %288 = vmatpush.msrb.mxu2 %v227_v63 }
  0x23   :  { %308 = vmatpush.msrb.mxu3 %v243_v0  ;;  %111 = vmatpush.msra.mxu0 %v22_v1 }
  0x24   :  { %131 = vmatpush.msra.mxu1 %v23_v2  ;;  %112 = vmatmul.f32.vlgmr.msra.gmra.mxu0 %v21_v60 }
  0x25   :  { %132 = vmatmul.f32.vlgmr.msra.gmra.mxu1 %v21_v60  ;;  %248 = vmatpush.msrb.mxu0 %v195_v3 }
  0x26   :  { %289 = vmatpush.msrb.mxu2 %v226_v4  ;;  %268 = vmatpush.msrb.mxu1 %v211_v5 }
  0x27   :  { %309 = vmatpush.msrb.mxu3 %v242_v6 }
  0x28   :  { %10 = vsyncpa [#allocation3], 0  ;;  %249 = vmatpush.msrb.mxu0 %v194_v7  ;;  %290 = vmatpush.msrb.mxu2 %v225_v8  ;;  %v209_v13 = vld [vmem:[%s803_s3 + $0xe8] sm:$0xff]  ;;  %v240_v14 = vld [vmem:[%s803_s3 + $0x1e0] sm:$0xff]  ;;  %s373_s18 = smov [#allocation2]   ;;  %s336_s22 = sshll.u32 %s805_s5, 4  ;;  %s337_s22 = int_to_ptr.hbm [resolvable:$true] %s336_s22 }
  0x29   :  { %269 = vmatpush.msrb.mxu1 %v210_v10  ;;  %310 = vmatpush.msrb.mxu3 %v241_v11  ;;  %v192_v15 = vld [vmem:[%s803_s3 + $0x60] sm:$0xff]  ;;  %v223_v16 = vld [vmem:[%s803_s3 + $0x158] sm:$0xff]  ;;  %v222_v20 = vld [vmem:[%s803_s3 + $0x150] sm:$0xff]  ;;  %s334_s19 = sshll.u32 %s373_s18, 4  ;;  %s335_s19 = int_to_ptr.vmem [resolvable:$true] %s334_s19 }
  0x2a   :  { %250 = vmatpush.msrb.mxu0 %v193_v9  ;;  %291 = vmatpush.msrb.mxu2 %v224_v12  ;;  %v208_v17 = vld [vmem:[%s803_s3 + $0xe0] sm:$0xff]  ;;  %v239_v18 = vld [vmem:[%s803_s3 + $0x1d8] sm:$0xff]  ;;  %v238_v22 = vld [vmem:[%s803_s3 + $0x1d0] sm:$0xff] }
  0x2b   :  { %270 = vmatpush.msrb.mxu1 %v209_v13  ;;  %311 = vmatpush.msrb.mxu3 %v240_v14  ;;  %v191_v19 = vld [vmem:[%s803_s3 + $0x58] sm:$0xff]  ;;  %v190_v23 = vld [vmem:[%s803_s3 + $0x50] sm:$0xff]  ;;  %v221_v24 = vld [vmem:[%s803_s3 + $0x148] sm:$0xff] }
  0x2c   :  { %251 = vmatpush.msrb.mxu0 %v192_v15  ;;  %292 = vmatpush.msrb.mxu2 %v223_v16  ;;  %v207_v21 = vld [vmem:[%s803_s3 + $0xd8] sm:$0xff]  ;;  %v206_v25 = vld [vmem:[%s803_s3 + $0xd0] sm:$0xff]  ;;  %v237_v26 = vld [vmem:[%s803_s3 + $0x1c8] sm:$0xff] }
  0x2d   :  { %271 = vmatpush.msrb.mxu1 %v208_v17  ;;  %312 = vmatpush.msrb.mxu3 %v239_v18  ;;  %v189_v27 = vld [vmem:[%s803_s3 + $0x48] sm:$0xff]  ;;  %v220_v28 = vld [vmem:[%s803_s3 + $0x140] sm:$0xff]  ;;  %v219_v32 = vld [vmem:[%s803_s3 + $0x138] sm:$0xff] }
  0x2e   :  { %252 = vmatpush.msrb.mxu0 %v191_v19  ;;  %293 = vmatpush.msrb.mxu2 %v222_v20  ;;  %v205_v29 = vld [vmem:[%s803_s3 + $0xc8] sm:$0xff]  ;;  %v236_v30 = vld [vmem:[%s803_s3 + $0x1c0] sm:$0xff]  ;;  %v235_v34 = vld [vmem:[%s803_s3 + $0x1b8] sm:$0xff] }
  0x2f   :  { %272 = vmatpush.msrb.mxu1 %v207_v21  ;;  %313 = vmatpush.msrb.mxu3 %v238_v22  ;;  %v188_v31 = vld [vmem:[%s803_s3 + $0x40] sm:$0xff]  ;;  %v187_v35 = vld [vmem:[%s803_s3 + $0x38] sm:$0xff]  ;;  %v218_v36 = vld [vmem:[%s803_s3 + $0x130] sm:$0xff] }
  0x30   :  { %253 = vmatpush.msrb.mxu0 %v190_v23  ;;  %294 = vmatpush.msrb.mxu2 %v221_v24  ;;  %v204_v33 = vld [vmem:[%s803_s3 + $0xc0] sm:$0xff]  ;;  %v203_v37 = vld [vmem:[%s803_s3 + $0xb8] sm:$0xff]  ;;  %v234_v38 = vld [vmem:[%s803_s3 + $0x1b0] sm:$0xff] }
  0x31   :  { %273 = vmatpush.msrb.mxu1 %v206_v25  ;;  %314 = vmatpush.msrb.mxu3 %v237_v26  ;;  %v186_v39 = vld [vmem:[%s803_s3 + $0x30] sm:$0xff]  ;;  %v217_v40 = vld [vmem:[%s803_s3 + $0x128] sm:$0xff]  ;;  %v216_v44 = vld [vmem:[%s803_s3 + $0x120] sm:$0xff] }
  0x32   :  { %254 = vmatpush.msrb.mxu0 %v189_v27  ;;  %295 = vmatpush.msrb.mxu2 %v220_v28  ;;  %v202_v41 = vld [vmem:[%s803_s3 + $0xb0] sm:$0xff]  ;;  %v233_v42 = vld [vmem:[%s803_s3 + $0x1a8] sm:$0xff]  ;;  %v232_v46 = vld [vmem:[%s803_s3 + $0x1a0] sm:$0xff] }
  0x33   :  { %274 = vmatpush.msrb.mxu1 %v205_v29  ;;  %315 = vmatpush.msrb.mxu3 %v236_v30  ;;  %v185_v43 = vld [vmem:[%s803_s3 + $0x28] sm:$0xff]  ;;  %v184_v47 = vld [vmem:[%s803_s3 + $0x20] sm:$0xff]  ;;  %v215_v48 = vld [vmem:[%s803_s3 + $0x118] sm:$0xff] }
  0x34   :  { %255 = vmatpush.msrb.mxu0 %v188_v31  ;;  %296 = vmatpush.msrb.mxu2 %v219_v32  ;;  %v201_v45 = vld [vmem:[%s803_s3 + $0xa8] sm:$0xff]  ;;  %v183_v49 = vld [vmem:[%s803_s3 + $0x18] sm:$0xff]  ;;  %v200_v50 = vld [vmem:[%s803_s3 + $0xa0] sm:$0xff] }
  0x35   :  { %275 = vmatpush.msrb.mxu1 %v204_v33  ;;  %316 = vmatpush.msrb.mxu3 %v235_v34  ;;  %v214_v51 = vld [vmem:[%s803_s3 + $0x110] sm:$0xff]  ;;  %v231_v52 = vld [vmem:[%s803_s3 + $0x198] sm:$0xff]  ;;  %v213_v55 = vld [vmem:[%s803_s3 + $0x108] sm:$0xff] }
  0x36   :  { %256 = vmatpush.msrb.mxu0 %v187_v35  ;;  %297 = vmatpush.msrb.mxu2 %v218_v36  ;;  %v182_v53 = vld [vmem:[%s803_s3 + $0x10] sm:$0xff]  ;;  %v199_v54 = vld [vmem:[%s803_s3 + $0x98] sm:$0xff]  ;;  %v181_v57 = vld [vmem:[%s803_s3 + $0x8] sm:$0xff] }
  0x37   :  { %276 = vmatpush.msrb.mxu1 %v203_v37  ;;  %317 = vmatpush.msrb.mxu3 %v234_v38  ;;  %v230_v56 = vld [vmem:[%s803_s3 + $0x190] sm:$0xff]  ;;  %v212_v59 = vld [vmem:[%s803_s3 + $0x100] sm:$0xff]  ;;  %v229_v60 = vld [vmem:[%s803_s3 + $0x188] sm:$0xff] }
  0x38   :  { %257 = vmatpush.msrb.mxu0 %v186_v39  ;;  %298 = vmatpush.msrb.mxu2 %v217_v40  ;;  %v198_v58 = vld [vmem:[%s803_s3 + $0x90] sm:$0xff]  ;;  %v180_v61 = vld [vmem:[%s803_s3] sm:$0xff]  ;;  %v197_v62 = vld [vmem:[%s803_s3 + $0x88] sm:$0xff] }
  0x39   :  { %277 = vmatpush.msrb.mxu1 %v202_v41  ;;  %318 = vmatpush.msrb.mxu3 %v233_v42  ;;  %v228_v63 = vld [vmem:[%s803_s3 + $0x180] sm:$0xff] }
  0x3a   :  { %258 = vmatpush.msrb.mxu0 %v185_v43  ;;  %299 = vmatpush.msrb.mxu2 %v216_v44  ;;  %v196_v0 = vld [vmem:[%s803_s3 + $0x80] sm:$0xff] }
  0x3b   :  { %278 = vmatpush.msrb.mxu1 %v201_v45  ;;  %319 = vmatpush.msrb.mxu3 %v232_v46  ;;  %v86_v1 = vld [vmem:[%s802_s2] sm:$0xf] }
  0x3c   :  { %259 = vmatpush.msrb.mxu0 %v184_v47  ;;  %300 = vmatpush.msrb.mxu2 %v215_v48  ;;  %v88_v2 = vperm.slane %v86_v1, 0  ;;  %v89_v3 = vperm.slane %v86_v1, 1  ;;  %v90_v4 = vperm.slane %v86_v1, 2  ;;  %v91_v5 = vperm.slane %v86_v1, 3  ;;  %v346_v18 = vld [vmem:[%s804_s4] ss:$0 sm:$0xff] }
  0x3d   :  { %279 = vmatpush.msrb.mxu1 %v200_v50  ;;  %320 = vmatpush.msrb.mxu3 %v231_v52 }
  0x3e   :  { %260 = vmatpush.msrb.mxu0 %v183_v49  ;;  %301 = vmatpush.msrb.mxu2 %v214_v51 }
  0x3f   :  { %280 = vmatpush.msrb.mxu1 %v199_v54  ;;  %321 = vmatpush.msrb.mxu3 %v230_v56 }
  0x40   :  { %261 = vmatpush.msrb.mxu0 %v182_v53  ;;  %302 = vmatpush.msrb.mxu2 %v213_v55 }
  0x41   :  { %281 = vmatpush.msrb.mxu1 %v198_v58  ;;  %322 = vmatpush.msrb.mxu3 %v229_v60 }
  0x42   :  { %262 = vmatpush.msrb.mxu0 %v181_v57  ;;  %303 = vmatpush.msrb.mxu2 %v212_v59 }
  0x43   :  { %282 = vmatpush.msrb.mxu1 %v197_v62  ;;  %323 = vmatpush.msrb.mxu3 %v228_v63 }
  0x44   :  { %263 = vmatpush.msrb.mxu0 %v180_v61 }
  0x45   :  { %283 = vmatpush.msrb.mxu1 %v196_v0 }
  0xa1   :  { %v113_v6 = vpop.f32.mrf.mxu0 }
  0xa2   :  { %v133_v7 = vpop.f32.mrf.mxu1  ;;  %v114_v8 = vadd.f32 %v113_v6, %v88_v2 }
  0xa3   :  { %v134_v9 = vadd.f32 %v133_v7, %v89_v3 }
  0xa4   :  { %v153_v10 = vpop.f32.mrf.mxu2  ;;  %v173_v11 = vpop.f32.mrf.mxu3  ;;  %v176_v13 = vmax.f32 %v114_v8, 0.0 }
  0xa5   :  { %v154_v12 = vadd.f32 %v153_v10, %v90_v4  ;;  %v174_v14 = vadd.f32 %v173_v11, %v91_v5  ;;  %v177_v15 = vmax.f32 %v134_v9, 0.0 }
  0xa6   :  { %264 = vmatmul.f32.vlgmr.msrb.gmra.mxu0 %v176_v13 }
  0xa7   :  { %v178_v16 = vmax.f32 %v154_v12, 0.0  ;;  %v179_v17 = vmax.f32 %v174_v14, 0.0  ;;  %284 = vmatmul.f32.vlgmr.msrb.gmra.mxu1 %v177_v15 }
  0xa9   :  { %304 = vmatmul.f32.vlgmr.msrb.gmra.mxu2 %v178_v16  ;;  %324 = vmatmul.f32.vlgmr.msrb.gmra.mxu3 %v179_v17 }
 0x123   :  { %v265_v19 = vpop.f32.mrf.mxu0 }
 0x124   :  { %v266_v20 = vadd.f32 %v346_v18, %v265_v19  ;;  %v285_v21 = vpop.f32.mrf.mxu1 }
 0x126   :  { %v286_v22 = vadd.f32 %v285_v21, %v266_v20 }
 0x12c   :  { %v305_v23 = vpop.f32.mrf.mxu2  ;;  %v325_v24 = vpop.f32.mrf.mxu3 }
 0x12d   :  { %v306_v25 = vadd.f32 %v305_v23, %v286_v22 }
 0x12f   :  { %v326_v26 = vadd.f32 %v325_v24, %v306_v25 }
 0x131   :  { %328 = vst [vmem:[#allocation2] sm:$0xff] %v326_v26 }
 0x132   :  { %339 = dma.vmem_to_hbm [thread:$0]  %s335_s19, 128, %s337_s22, [#allocation3]  }
 0x133   :  { %371 = dma.done.wait [#allocation3], 128  }
 0x134   :  { %372 = vsyncadd [#allocation3], 4294967168 }
 0x135   :  { %344 = vsyncpa [#allocation3], 1 }

</bundles_post_ra>
